<compile_context>
chip_gen: v7x
topology: tpu7x:2x2x1
jax: 0.10.0
libtpu: 0.0.40
codegen_flags: <defaults>
</compile_context>

<pallas_src>
import jax
import jax.numpy as jnp
import numpy as np
from jax.experimental import pallas as pl
from jax.experimental.pallas import tpu as pltpu


def _make_kernel(Cin, Cout, W):
    W2 = 2 * W

    def kernel(x_ref, w_ref, b_ref, d_ref, o_ref):
        # x_ref : (1, Cin, TH, W)    VMEM   input tile (NCHW-native)
        # w_ref : (Cin, Cout)        SMEM   scalar weights
        # b_ref : (Cout,)            SMEM   scalar bias
        # d_ref : (W, 2W)            VMEM   constant 0/1 column dilation, D[j,2j]=1
        # o_ref : (1, Cout, TH, 4W)  VMEM   row i = [output row 2i | output row 2i+1]
        th = x_ref.shape[2]
        d = d_ref[...]                                        # (W, 2W)
        for c in range(Cout):                                 # tiny, unrolled
            b_c = b_ref[c]
            # Channel combine on the VPU: y = sum_k w[k, c] * x[k]   (TH, W)
            y = x_ref[0, 0] * w_ref[0, c]
            for k in range(1, Cin):
                y = y + x_ref[0, k] * w_ref[k, c]
            # Even output rows: column-dilate W -> 2W (data at even cols) on the
            # MXU with the tiny 0/1 matrix; "+ b" makes odd cols pure bias.
            even = jnp.dot(y, d, preferred_element_type=jnp.float32) + b_c
            o_ref[0, c, :, 0:W2] = even.astype(o_ref.dtype)
            # Odd output rows: pure bias.
            o_ref[0, c, :, W2:2 * W2] = jnp.broadcast_to(
                b_c, (th, W2)).astype(o_ref.dtype)

    return kernel


def _vmem_budget():
    """(double-buffered block budget, vmem_limit_bytes), sized per generation
    (v7x: 64 MiB per TensorCore; v5e/v6e: 128 MiB physical)."""
    try:
        cap = int(pltpu.get_tpu_info().vmem_capacity_bytes)
    except Exception:
        cap = 64 * 1024 * 1024            # conservative: v7x per-core VMEM
    limit = min((cap * 7) // 8, 96 * 1024 * 1024)
    return (limit * 3) // 4, limit        # leave headroom for internal scratch


def _pick_th(N, Cin, Cout, H, W, itemsize, block_budget):
    """Largest legal row tile TH (multiple of 8 dividing H, or H itself) whose
    double-buffered in+out blocks fit the VMEM budget; prefer >= 4 total grid
    steps so v7x's two TensorCores both get work and DMA overlaps compute."""
    cands = [t for t in range(8, H + 1, 8) if H % t == 0] or [H]
    # TODO(synk): pad H (or mask the last block) for large images whose H has
    # no multiple-of-8 divisor instead of falling back to a full-H block.

    def step_bytes(t):
        x_blk = Cin * t * W * itemsize
        o_blk = Cout * t * 4 * W * itemsize
        d_blk = W * 2 * W * 4
        return 2 * (x_blk + o_blk) + 2 * d_blk        # x2: double-buffered

    fitting = [t for t in cands if step_bytes(t) <= block_budget] or [min(cands)]
    pref = [t for t in fitting if N * (H // t) >= 4]
    return max(pref or fitting)


def downsample_block(x_nchw, weight, bias):
    """x_nchw: (N, Cin, H, W); weight: (Cin, Cout) squeezed ConvTranspose2d
    weight (a raw (Cin, Cout, 1, 1) is accepted too); bias: (Cout,).
    Returns (N, Cout, 2H, 2W)."""
    if weight.ndim == 4:
        weight = weight[:, :, 0, 0]
    N, Cin, H, W = x_nchw.shape
    Cout = weight.shape[1]

    block_budget, vmem_limit = _vmem_budget()
    th = _pick_th(N, Cin, Cout, H, W, x_nchw.dtype.itemsize, block_budget)

    # Constant 0/1 column-dilation matrix, built host-side (no on-device scatter).
    d_np = np.zeros((W, 2 * W), dtype=np.float32)
    d_np[np.arange(W), 2 * np.arange(W)] = 1.0
    dmat = jnp.asarray(d_np)

    out4 = pl.pallas_call(
        _make_kernel(Cin, Cout, W),
        out_shape=jax.ShapeDtypeStruct((N, Cout, H, 4 * W), x_nchw.dtype),
        grid_spec=pltpu.PrefetchScalarGridSpec(
            num_scalar_prefetch=0,
            grid=(N, H // th),
            in_specs=[
                pl.BlockSpec((1, Cin, th, W), lambda n, h: (n, 0, h, 0)),
                pl.BlockSpec(memory_space=pltpu.MemorySpace.SMEM),   # weight
                pl.BlockSpec(memory_space=pltpu.MemorySpace.SMEM),   # bias
                pl.BlockSpec((W, 2 * W), lambda n, h: (0, 0)),       # dilation
            ],
            out_specs=pl.BlockSpec((1, Cout, th, 4 * W),
                                   lambda n, h: (n, 0, h, 0)),
        ),
        compiler_params=pltpu.CompilerParams(
            dimension_semantics=("parallel", "parallel"),
            vmem_limit_bytes=vmem_limit,
        ),
    )(x_nchw, weight, bias, dmat)

    # Free contiguous reshape: out4[n, c, i, :] = [output row 2i | row 2i+1].
    return out4.reshape(N, Cout, 2 * H, 2 * W)


def _reference(x, weight, bias):
    N, Cin, H, W = x.shape
    Cout = weight.shape[1]
    y = jnp.einsum('nkhw,kc->nchw', x, weight,
                   precision=jax.lax.Precision.HIGHEST)
    y = y + bias[None, :, None, None]
    out = jnp.broadcast_to(bias[None, :, None, None],
                           (N, Cout, 2 * H, 2 * W)).astype(x.dtype)
    return out.at[:, :, ::2, ::2].set(y.astype(x.dtype))


if __name__ == "__main__":
    key = jax.random.PRNGKey(0)
    k_x, k_w, k_b = jax.random.split(key, 3)

    N, Cin, Cout, H, W = 2, 4, 8, 16, 16

    x = jax.random.normal(k_x, (N, Cin, H, W), dtype=jnp.float32)
    # ConvTranspose2d weight is (Cin, Cout, 1, 1); we keep the squeezed (Cin, Cout).
    weight = jax.random.normal(k_w, (Cin, Cout), dtype=jnp.float32) * 0.1
    bias = jax.random.normal(k_b, (Cout,), dtype=jnp.float32) * 0.1

    out = jax.block_until_ready(downsample_block(x, weight, bias))

    ref = _reference(x, weight, bias)
    assert out.shape == (N, Cout, 2 * H, 2 * W), out.shape
    assert jnp.allclose(out, ref, atol=1e-4, rtol=1e-4), "mismatch vs reference"

    print("KERNEL_OK")
</pallas_src>

<mosaic_0001>
module attributes {stable_mosaic.version = 11 : i64} {
  func.func @kernel(%arg0: i32, %arg1: i32, %arg2: memref<1x4x8x16xf32, #tpu.memory_space<vmem>>, %arg3: memref<4x8xf32, #tpu.memory_space<smem>>, %arg4: memref<8xf32, #tpu.memory_space<smem>>, %arg5: memref<16x32xf32, #tpu.memory_space<vmem>>, %arg6: memref<1x8x8x64xf32, #tpu.memory_space<vmem>>) attributes {dimension_semantics = [#tpu.dimension_semantics<parallel>, #tpu.dimension_semantics<parallel>], iteration_bounds = array<i64: 2, 2>, scalar_prefetch = 0 : i64, scratch_operands = 0 : i64, tpu.core_type = #tpu.core_type<tc>, window_params = [{transform_indices = @transform_0, window_bounds = array<i64: 1, 4, 8, 16>}, {transform_indices = @transform_1, window_bounds = array<i64: 4, 8>}, {transform_indices = @transform_2, window_bounds = array<i64: 8>}, {pipeline_mode = #tpu.pipeline_mode<synchronous>, transform_indices = @transform_3, window_bounds = array<i64: 16, 32>}, {transform_indices = @transform_4, window_bounds = array<i64: 1, 8, 8, 64>}]} {
    %c0 = arith.constant 0 : index
    %c0_0 = arith.constant 0 : index
    %0 = vector.load %arg5[%c0, %c0_0] : memref<16x32xf32, #tpu.memory_space<vmem>>, vector<16x32xf32>
    %c0_1 = arith.constant 0 : index
    %1 = memref.load %arg4[%c0_1] : memref<8xf32, #tpu.memory_space<smem>>
    %c0_2 = arith.constant 0 : index
    %c0_3 = arith.constant 0 : index
    %c0_4 = arith.constant 0 : index
    %c0_5 = arith.constant 0 : index
    %2 = vector.load %arg2[%c0_2, %c0_3, %c0_4, %c0_5] : memref<1x4x8x16xf32, #tpu.memory_space<vmem>>, vector<1x1x8x16xf32>
    %3 = vector.shape_cast %2 : vector<1x1x8x16xf32> to vector<8x16xf32>
    %c0_6 = arith.constant 0 : index
    %c0_7 = arith.constant 0 : index
    %4 = memref.load %arg3[%c0_6, %c0_7] : memref<4x8xf32, #tpu.memory_space<smem>>
    %5 = vector.broadcast %4 : f32 to vector<8x16xf32>
    %6 = arith.mulf %3, %5 : vector<8x16xf32>
    %c0_8 = arith.constant 0 : index
    %c1 = arith.constant 1 : index
    %c0_9 = arith.constant 0 : index
    %c0_10 = arith.constant 0 : index
    %7 = vector.load %arg2[%c0_8, %c1, %c0_9, %c0_10] : memref<1x4x8x16xf32, #tpu.memory_space<vmem>>, vector<1x1x8x16xf32>
    %8 = vector.shape_cast %7 : vector<1x1x8x16xf32> to vector<8x16xf32>
    %c1_11 = arith.constant 1 : index
    %c0_12 = arith.constant 0 : index
    %9 = memref.load %arg3[%c1_11, %c0_12] : memref<4x8xf32, #tpu.memory_space<smem>>
    %10 = vector.broadcast %9 : f32 to vector<8x16xf32>
    %11 = arith.mulf %8, %10 : vector<8x16xf32>
    %12 = arith.addf %6, %11 : vector<8x16xf32>
    %c0_13 = arith.constant 0 : index
    %c2 = arith.constant 2 : index
    %c0_14 = arith.constant 0 : index
    %c0_15 = arith.constant 0 : index
    %13 = vector.load %arg2[%c0_13, %c2, %c0_14, %c0_15] : memref<1x4x8x16xf32, #tpu.memory_space<vmem>>, vector<1x1x8x16xf32>
    %14 = vector.shape_cast %13 : vector<1x1x8x16xf32> to vector<8x16xf32>
    %c2_16 = arith.constant 2 : index
    %c0_17 = arith.constant 0 : index
    %15 = memref.load %arg3[%c2_16, %c0_17] : memref<4x8xf32, #tpu.memory_space<smem>>
    %16 = vector.broadcast %15 : f32 to vector<8x16xf32>
    %17 = arith.mulf %14, %16 : vector<8x16xf32>
    %18 = arith.addf %12, %17 : vector<8x16xf32>
    %c0_18 = arith.constant 0 : index
    %c3 = arith.constant 3 : index
    %c0_19 = arith.constant 0 : index
    %c0_20 = arith.constant 0 : index
    %19 = vector.load %arg2[%c0_18, %c3, %c0_19, %c0_20] : memref<1x4x8x16xf32, #tpu.memory_space<vmem>>, vector<1x1x8x16xf32>
    %20 = vector.shape_cast %19 : vector<1x1x8x16xf32> to vector<8x16xf32>
    %c3_21 = arith.constant 3 : index
    %c0_22 = arith.constant 0 : index
    %21 = memref.load %arg3[%c3_21, %c0_22] : memref<4x8xf32, #tpu.memory_space<smem>>
    %22 = vector.broadcast %21 : f32 to vector<8x16xf32>
    %23 = arith.mulf %20, %22 : vector<8x16xf32>
    %24 = arith.addf %18, %23 : vector<8x16xf32>
    %cst = arith.constant dense<0.000000e+00> : vector<8x32xf32>
    %25 = tpu.matmul %24, %0, %cst {dimension_numbers = #tpu.dot_dimension_numbers<[1], [0], [0], [1], [0, 0, 1, 1], [], []>} : vector<8x16xf32>, vector<16x32xf32>, vector<8x32xf32> -> vector<8x32xf32>
    %26 = vector.broadcast %1 : f32 to vector<8x32xf32>
    %27 = arith.addf %25, %26 : vector<8x32xf32>
    %c0_23 = arith.constant 0 : index
    %c0_24 = arith.constant 0 : index
    %c0_25 = arith.constant 0 : index
    %c0_26 = arith.constant 0 : index
    %28 = vector.load %arg6[%c0_23, %c0_24, %c0_25, %c0_26] : memref<1x8x8x64xf32, #tpu.memory_space<vmem>>, vector<1x1x8x32xf32>
    %29 = vector.shape_cast %28 : vector<1x1x8x32xf32> to vector<8x32xf32>
    %30 = vector.shape_cast %27 : vector<8x32xf32> to vector<1x1x8x32xf32>
    tpu.vector_store %arg6[%c0_23, %c0_24, %c0_25, %c0_26], %30 {strides = array<i32>} : memref<1x8x8x64xf32, #tpu.memory_space<vmem>>, vector<1x1x8x32xf32>,
    %31 = vector.broadcast %1 : f32 to vector<8x32xf32>
    %c0_27 = arith.constant 0 : index
    %c0_28 = arith.constant 0 : index
    %c0_29 = arith.constant 0 : index
    %c32 = arith.constant 32 : index
    %32 = vector.load %arg6[%c0_27, %c0_28, %c0_29, %c32] : memref<1x8x8x64xf32, #tpu.memory_space<vmem>>, vector<1x1x8x32xf32>
    %33 = vector.shape_cast %32 : vector<1x1x8x32xf32> to vector<8x32xf32>
    %34 = vector.shape_cast %31 : vector<8x32xf32> to vector<1x1x8x32xf32>
    tpu.vector_store %arg6[%c0_27, %c0_28, %c0_29, %c32], %34 {strides = array<i32>} : memref<1x8x8x64xf32, #tpu.memory_space<vmem>>, vector<1x1x8x32xf32>,
    %c1_30 = arith.constant 1 : index
    %35 = memref.load %arg4[%c1_30] : memref<8xf32, #tpu.memory_space<smem>>
    %c0_31 = arith.constant 0 : index
    %c0_32 = arith.constant 0 : index
    %c0_33 = arith.constant 0 : index
    %c0_34 = arith.constant 0 : index
    %36 = vector.load %arg2[%c0_31, %c0_32, %c0_33, %c0_34] : memref<1x4x8x16xf32, #tpu.memory_space<vmem>>, vector<1x1x8x16xf32>
    %37 = vector.shape_cast %36 : vector<1x1x8x16xf32> to vector<8x16xf32>
    %c0_35 = arith.constant 0 : index
    %c1_36 = arith.constant 1 : index
    %38 = memref.load %arg3[%c0_35, %c1_36] : memref<4x8xf32, #tpu.memory_space<smem>>
    %39 = vector.broadcast %38 : f32 to vector<8x16xf32>
    %40 = arith.mulf %37, %39 : vector<8x16xf32>
    %c0_37 = arith.constant 0 : index
    %c1_38 = arith.constant 1 : index
    %c0_39 = arith.constant 0 : index
    %c0_40 = arith.constant 0 : index
    %41 = vector.load %arg2[%c0_37, %c1_38, %c0_39, %c0_40] : memref<1x4x8x16xf32, #tpu.memory_space<vmem>>, vector<1x1x8x16xf32>
    %42 = vector.shape_cast %41 : vector<1x1x8x16xf32> to vector<8x16xf32>
    %c1_41 = arith.constant 1 : index
    %c1_42 = arith.constant 1 : index
    %43 = memref.load %arg3[%c1_41, %c1_42] : memref<4x8xf32, #tpu.memory_space<smem>>
    %44 = vector.broadcast %43 : f32 to vector<8x16xf32>
    %45 = arith.mulf %42, %44 : vector<8x16xf32>
    %46 = arith.addf %40, %45 : vector<8x16xf32>
    %c0_43 = arith.constant 0 : index
    %c2_44 = arith.constant 2 : index
    %c0_45 = arith.constant 0 : index
    %c0_46 = arith.constant 0 : index
    %47 = vector.load %arg2[%c0_43, %c2_44, %c0_45, %c0_46] : memref<1x4x8x16xf32, #tpu.memory_space<vmem>>, vector<1x1x8x16xf32>
    %48 = vector.shape_cast %47 : vector<1x1x8x16xf32> to vector<8x16xf32>
    %c2_47 = arith.constant 2 : index
    %c1_48 = arith.constant 1 : index
    %49 = memref.load %arg3[%c2_47, %c1_48] : memref<4x8xf32, #tpu.memory_space<smem>>
    %50 = vector.broadcast %49 : f32 to vector<8x16xf32>
    %51 = arith.mulf %48, %50 : vector<8x16xf32>
    %52 = arith.addf %46, %51 : vector<8x16xf32>
    %c0_49 = arith.constant 0 : index
    %c3_50 = arith.constant 3 : index
    %c0_51 = arith.constant 0 : index
    %c0_52 = arith.constant 0 : index
    %53 = vector.load %arg2[%c0_49, %c3_50, %c0_51, %c0_52] : memref<1x4x8x16xf32, #tpu.memory_space<vmem>>, vector<1x1x8x16xf32>
    %54 = vector.shape_cast %53 : vector<1x1x8x16xf32> to vector<8x16xf32>
    %c3_53 = arith.constant 3 : index
    %c1_54 = arith.constant 1 : index
    %55 = memref.load %arg3[%c3_53, %c1_54] : memref<4x8xf32, #tpu.memory_space<smem>>
    %56 = vector.broadcast %55 : f32 to vector<8x16xf32>
    %57 = arith.mulf %54, %56 : vector<8x16xf32>
    %58 = arith.addf %52, %57 : vector<8x16xf32>
    %cst_55 = arith.constant dense<0.000000e+00> : vector<8x32xf32>
    %59 = tpu.matmul %58, %0, %cst_55 {dimension_numbers = #tpu.dot_dimension_numbers<[1], [0], [0], [1], [0, 0, 1, 1], [], []>} : vector<8x16xf32>, vector<16x32xf32>, vector<8x32xf32> -> vector<8x32xf32>
    %60 = vector.broadcast %35 : f32 to vector<8x32xf32>
    %61 = arith.addf %59, %60 : vector<8x32xf32>
    %c0_56 = arith.constant 0 : index
    %c1_57 = arith.constant 1 : index
    %c0_58 = arith.constant 0 : index
    %c0_59 = arith.constant 0 : index
    %62 = vector.load %arg6[%c0_56, %c1_57, %c0_58, %c0_59] : memref<1x8x8x64xf32, #tpu.memory_space<vmem>>, vector<1x1x8x32xf32>
    %63 = vector.shape_cast %62 : vector<1x1x8x32xf32> to vector<8x32xf32>
    %64 = vector.shape_cast %61 : vector<8x32xf32> to vector<1x1x8x32xf32>
    tpu.vector_store %arg6[%c0_56, %c1_57, %c0_58, %c0_59], %64 {strides = array<i32>} : memref<1x8x8x64xf32, #tpu.memory_space<vmem>>, vector<1x1x8x32xf32>,
    %65 = vector.broadcast %35 : f32 to vector<8x32xf32>
    %c0_60 = arith.constant 0 : index
    %c1_61 = arith.constant 1 : index
    %c0_62 = arith.constant 0 : index
    %c32_63 = arith.constant 32 : index
    %66 = vector.load %arg6[%c0_60, %c1_61, %c0_62, %c32_63] : memref<1x8x8x64xf32, #tpu.memory_space<vmem>>, vector<1x1x8x32xf32>
    %67 = vector.shape_cast %66 : vector<1x1x8x32xf32> to vector<8x32xf32>
    %68 = vector.shape_cast %65 : vector<8x32xf32> to vector<1x1x8x32xf32>
    tpu.vector_store %arg6[%c0_60, %c1_61, %c0_62, %c32_63], %68 {strides = array<i32>} : memref<1x8x8x64xf32, #tpu.memory_space<vmem>>, vector<1x1x8x32xf32>,
    %c2_64 = arith.constant 2 : index
    %69 = memref.load %arg4[%c2_64] : memref<8xf32, #tpu.memory_space<smem>>
    %c0_65 = arith.constant 0 : index
    %c0_66 = arith.constant 0 : index
    %c0_67 = arith.constant 0 : index
    %c0_68 = arith.constant 0 : index
    %70 = vector.load %arg2[%c0_65, %c0_66, %c0_67, %c0_68] : memref<1x4x8x16xf32, #tpu.memory_space<vmem>>, vector<1x1x8x16xf32>
    %71 = vector.shape_cast %70 : vector<1x1x8x16xf32> to vector<8x16xf32>
    %c0_69 = arith.constant 0 : index
    %c2_70 = arith.constant 2 : index
    %72 = memref.load %arg3[%c0_69, %c2_70] : memref<4x8xf32, #tpu.memory_space<smem>>
    %73 = vector.broadcast %72 : f32 to vector<8x16xf32>
    %74 = arith.mulf %71, %73 : vector<8x16xf32>
    %c0_71 = arith.constant 0 : index
    %c1_72 = arith.constant 1 : index
    %c0_73 = arith.constant 0 : index
    %c0_74 = arith.constant 0 : index
    %75 = vector.load %arg2[%c0_71, %c1_72, %c0_73, %c0_74] : memref<1x4x8x16xf32, #tpu.memory_space<vmem>>, vector<1x1x8x16xf32>
    %76 = vector.shape_cast %75 : vector<1x1x8x16xf32> to vector<8x16xf32>
    %c1_75 = arith.constant 1 : index
    %c2_76 = arith.constant 2 : index
    %77 = memref.load %arg3[%c1_75, %c2_76] : memref<4x8xf32, #tpu.memory_space<smem>>
    %78 = vector.broadcast %77 : f32 to vector<8x16xf32>
    %79 = arith.mulf %76, %78 : vector<8x16xf32>
    %80 = arith.addf %74, %79 : vector<8x16xf32>
    %c0_77 = arith.constant 0 : index
    %c2_78 = arith.constant 2 : index
    %c0_79 = arith.constant 0 : index
    %c0_80 = arith.constant 0 : index
    %81 = vector.load %arg2[%c0_77, %c2_78, %c0_79, %c0_80] : memref<1x4x8x16xf32, #tpu.memory_space<vmem>>, vector<1x1x8x16xf32>
    %82 = vector.shape_cast %81 : vector<1x1x8x16xf32> to vector<8x16xf32>
    %c2_81 = arith.constant 2 : index
    %c2_82 = arith.constant 2 : index
    %83 = memref.load %arg3[%c2_81, %c2_82] : memref<4x8xf32, #tpu.memory_space<smem>>
    %84 = vector.broadcast %83 : f32 to vector<8x16xf32>
    %85 = arith.mulf %82, %84 : vector<8x16xf32>
    %86 = arith.addf %80, %85 : vector<8x16xf32>
    %c0_83 = arith.constant 0 : index
    %c3_84 = arith.constant 3 : index
    %c0_85 = arith.constant 0 : index
    %c0_86 = arith.constant 0 : index
    %87 = vector.load %arg2[%c0_83, %c3_84, %c0_85, %c0_86] : memref<1x4x8x16xf32, #tpu.memory_space<vmem>>, vector<1x1x8x16xf32>
    %88 = vector.shape_cast %87 : vector<1x1x8x16xf32> to vector<8x16xf32>
    %c3_87 = arith.constant 3 : index
    %c2_88 = arith.constant 2 : index
    %89 = memref.load %arg3[%c3_87, %c2_88] : memref<4x8xf32, #tpu.memory_space<smem>>
    %90 = vector.broadcast %89 : f32 to vector<8x16xf32>
    %91 = arith.mulf %88, %90 : vector<8x16xf32>
    %92 = arith.addf %86, %91 : vector<8x16xf32>
    %cst_89 = arith.constant dense<0.000000e+00> : vector<8x32xf32>
    %93 = tpu.matmul %92, %0, %cst_89 {dimension_numbers = #tpu.dot_dimension_numbers<[1], [0], [0], [1], [0, 0, 1, 1], [], []>} : vector<8x16xf32>, vector<16x32xf32>, vector<8x32xf32> -> vector<8x32xf32>
    %94 = vector.broadcast %69 : f32 to vector<8x32xf32>
    %95 = arith.addf %93, %94 : vector<8x32xf32>
    %c0_90 = arith.constant 0 : index
    %c2_91 = arith.constant 2 : index
    %c0_92 = arith.constant 0 : index
    %c0_93 = arith.constant 0 : index
    %96 = vector.load %arg6[%c0_90, %c2_91, %c0_92, %c0_93] : memref<1x8x8x64xf32, #tpu.memory_space<vmem>>, vector<1x1x8x32xf32>
    %97 = vector.shape_cast %96 : vector<1x1x8x32xf32> to vector<8x32xf32>
    %98 = vector.shape_cast %95 : vector<8x32xf32> to vector<1x1x8x32xf32>
    tpu.vector_store %arg6[%c0_90, %c2_91, %c0_92, %c0_93], %98 {strides = array<i32>} : memref<1x8x8x64xf32, #tpu.memory_space<vmem>>, vector<1x1x8x32xf32>,
    %99 = vector.broadcast %69 : f32 to vector<8x32xf32>
    %c0_94 = arith.constant 0 : index
    %c2_95 = arith.constant 2 : index
    %c0_96 = arith.constant 0 : index
    %c32_97 = arith.constant 32 : index
    %100 = vector.load %arg6[%c0_94, %c2_95, %c0_96, %c32_97] : memref<1x8x8x64xf32, #tpu.memory_space<vmem>>, vector<1x1x8x32xf32>
    %101 = vector.shape_cast %100 : vector<1x1x8x32xf32> to vector<8x32xf32>
    %102 = vector.shape_cast %99 : vector<8x32xf32> to vector<1x1x8x32xf32>
    tpu.vector_store %arg6[%c0_94, %c2_95, %c0_96, %c32_97], %102 {strides = array<i32>} : memref<1x8x8x64xf32, #tpu.memory_space<vmem>>, vector<1x1x8x32xf32>,
    %c3_98 = arith.constant 3 : index
    %103 = memref.load %arg4[%c3_98] : memref<8xf32, #tpu.memory_space<smem>>
    %c0_99 = arith.constant 0 : index
    %c0_100 = arith.constant 0 : index
    %c0_101 = arith.constant 0 : index
    %c0_102 = arith.constant 0 : index
    %104 = vector.load %arg2[%c0_99, %c0_100, %c0_101, %c0_102] : memref<1x4x8x16xf32, #tpu.memory_space<vmem>>, vector<1x1x8x16xf32>
    %105 = vector.shape_cast %104 : vector<1x1x8x16xf32> to vector<8x16xf32>
    %c0_103 = arith.constant 0 : index
    %c3_104 = arith.constant 3 : index
    %106 = memref.load %arg3[%c0_103, %c3_104] : memref<4x8xf32, #tpu.memory_space<smem>>
    %107 = vector.broadcast %106 : f32 to vector<8x16xf32>
    %108 = arith.mulf %105, %107 : vector<8x16xf32>
    %c0_105 = arith.constant 0 : index
    %c1_106 = arith.constant 1 : index
    %c0_107 = arith.constant 0 : index
    %c0_108 = arith.constant 0 : index
    %109 = vector.load %arg2[%c0_105, %c1_106, %c0_107, %c0_108] : memref<1x4x8x16xf32, #tpu.memory_space<vmem>>, vector<1x1x8x16xf32>
    %110 = vector.shape_cast %109 : vector<1x1x8x16xf32> to vector<8x16xf32>
    %c1_109 = arith.constant 1 : index
    %c3_110 = arith.constant 3 : index
    %111 = memref.load %arg3[%c1_109, %c3_110] : memref<4x8xf32, #tpu.memory_space<smem>>
    %112 = vector.broadcast %111 : f32 to vector<8x16xf32>
    %113 = arith.mulf %110, %112 : vector<8x16xf32>
    %114 = arith.addf %108, %113 : vector<8x16xf32>
    %c0_111 = arith.constant 0 : index
    %c2_112 = arith.constant 2 : index
    %c0_113 = arith.constant 0 : index
    %c0_114 = arith.constant 0 : index
    %115 = vector.load %arg2[%c0_111, %c2_112, %c0_113, %c0_114] : memref<1x4x8x16xf32, #tpu.memory_space<vmem>>, vector<1x1x8x16xf32>
    %116 = vector.shape_cast %115 : vector<1x1x8x16xf32> to vector<8x16xf32>
    %c2_115 = arith.constant 2 : index
    %c3_116 = arith.constant 3 : index
    %117 = memref.load %arg3[%c2_115, %c3_116] : memref<4x8xf32, #tpu.memory_space<smem>>
    %118 = vector.broadcast %117 : f32 to vector<8x16xf32>
    %119 = arith.mulf %116, %118 : vector<8x16xf32>
    %120 = arith.addf %114, %119 : vector<8x16xf32>
    %c0_117 = arith.constant 0 : index
    %c3_118 = arith.constant 3 : index
    %c0_119 = arith.constant 0 : index
    %c0_120 = arith.constant 0 : index
    %121 = vector.load %arg2[%c0_117, %c3_118, %c0_119, %c0_120] : memref<1x4x8x16xf32, #tpu.memory_space<vmem>>, vector<1x1x8x16xf32>
    %122 = vector.shape_cast %121 : vector<1x1x8x16xf32> to vector<8x16xf32>
    %c3_121 = arith.constant 3 : index
    %c3_122 = arith.constant 3 : index
    %123 = memref.load %arg3[%c3_121, %c3_122] : memref<4x8xf32, #tpu.memory_space<smem>>
    %124 = vector.broadcast %123 : f32 to vector<8x16xf32>
    %125 = arith.mulf %122, %124 : vector<8x16xf32>
    %126 = arith.addf %120, %125 : vector<8x16xf32>
    %cst_123 = arith.constant dense<0.000000e+00> : vector<8x32xf32>
    %127 = tpu.matmul %126, %0, %cst_123 {dimension_numbers = #tpu.dot_dimension_numbers<[1], [0], [0], [1], [0, 0, 1, 1], [], []>} : vector<8x16xf32>, vector<16x32xf32>, vector<8x32xf32> -> vector<8x32xf32>
    %128 = vector.broadcast %103 : f32 to vector<8x32xf32>
    %129 = arith.addf %127, %128 : vector<8x32xf32>
    %c0_124 = arith.constant 0 : index
    %c3_125 = arith.constant 3 : index
    %c0_126 = arith.constant 0 : index
    %c0_127 = arith.constant 0 : index
    %130 = vector.load %arg6[%c0_124, %c3_125, %c0_126, %c0_127] : memref<1x8x8x64xf32, #tpu.memory_space<vmem>>, vector<1x1x8x32xf32>
    %131 = vector.shape_cast %130 : vector<1x1x8x32xf32> to vector<8x32xf32>
    %132 = vector.shape_cast %129 : vector<8x32xf32> to vector<1x1x8x32xf32>
    tpu.vector_store %arg6[%c0_124, %c3_125, %c0_126, %c0_127], %132 {strides = array<i32>} : memref<1x8x8x64xf32, #tpu.memory_space<vmem>>, vector<1x1x8x32xf32>,
    %133 = vector.broadcast %103 : f32 to vector<8x32xf32>
    %c0_128 = arith.constant 0 : index
    %c3_129 = arith.constant 3 : index
    %c0_130 = arith.constant 0 : index
    %c32_131 = arith.constant 32 : index
    %134 = vector.load %arg6[%c0_128, %c3_129, %c0_130, %c32_131] : memref<1x8x8x64xf32, #tpu.memory_space<vmem>>, vector<1x1x8x32xf32>
    %135 = vector.shape_cast %134 : vector<1x1x8x32xf32> to vector<8x32xf32>
    %136 = vector.shape_cast %133 : vector<8x32xf32> to vector<1x1x8x32xf32>
    tpu.vector_store %arg6[%c0_128, %c3_129, %c0_130, %c32_131], %136 {strides = array<i32>} : memref<1x8x8x64xf32, #tpu.memory_space<vmem>>, vector<1x1x8x32xf32>,
    %c4 = arith.constant 4 : index
    %137 = memref.load %arg4[%c4] : memref<8xf32, #tpu.memory_space<smem>>
    %c0_132 = arith.constant 0 : index
    %c0_133 = arith.constant 0 : index
    %c0_134 = arith.constant 0 : index
    %c0_135 = arith.constant 0 : index
    %138 = vector.load %arg2[%c0_132, %c0_133, %c0_134, %c0_135] : memref<1x4x8x16xf32, #tpu.memory_space<vmem>>, vector<1x1x8x16xf32>
    %139 = vector.shape_cast %138 : vector<1x1x8x16xf32> to vector<8x16xf32>
    %c0_136 = arith.constant 0 : index
    %c4_137 = arith.constant 4 : index
    %140 = memref.load %arg3[%c0_136, %c4_137] : memref<4x8xf32, #tpu.memory_space<smem>>
    %141 = vector.broadcast %140 : f32 to vector<8x16xf32>
    %142 = arith.mulf %139, %141 : vector<8x16xf32>
    %c0_138 = arith.constant 0 : index
    %c1_139 = arith.constant 1 : index
    %c0_140 = arith.constant 0 : index
    %c0_141 = arith.constant 0 : index
    %143 = vector.load %arg2[%c0_138, %c1_139, %c0_140, %c0_141] : memref<1x4x8x16xf32, #tpu.memory_space<vmem>>, vector<1x1x8x16xf32>
    %144 = vector.shape_cast %143 : vector<1x1x8x16xf32> to vector<8x16xf32>
    %c1_142 = arith.constant 1 : index
    %c4_143 = arith.constant 4 : index
    %145 = memref.load %arg3[%c1_142, %c4_143] : memref<4x8xf32, #tpu.memory_space<smem>>
    %146 = vector.broadcast %145 : f32 to vector<8x16xf32>
    %147 = arith.mulf %144, %146 : vector<8x16xf32>
    %148 = arith.addf %142, %147 : vector<8x16xf32>
    %c0_144 = arith.constant 0 : index
    %c2_145 = arith.constant 2 : index
    %c0_146 = arith.constant 0 : index
    %c0_147 = arith.constant 0 : index
    %149 = vector.load %arg2[%c0_144, %c2_145, %c0_146, %c0_147] : memref<1x4x8x16xf32, #tpu.memory_space<vmem>>, vector<1x1x8x16xf32>
    %150 = vector.shape_cast %149 : vector<1x1x8x16xf32> to vector<8x16xf32>
    %c2_148 = arith.constant 2 : index
    %c4_149 = arith.constant 4 : index
    %151 = memref.load %arg3[%c2_148, %c4_149] : memref<4x8xf32, #tpu.memory_space<smem>>
    %152 = vector.broadcast %151 : f32 to vector<8x16xf32>
    %153 = arith.mulf %150, %152 : vector<8x16xf32>
    %154 = arith.addf %148, %153 : vector<8x16xf32>
    %c0_150 = arith.constant 0 : index
    %c3_151 = arith.constant 3 : index
    %c0_152 = arith.constant 0 : index
    %c0_153 = arith.constant 0 : index
    %155 = vector.load %arg2[%c0_150, %c3_151, %c0_152, %c0_153] : memref<1x4x8x16xf32, #tpu.memory_space<vmem>>, vector<1x1x8x16xf32>
    %156 = vector.shape_cast %155 : vector<1x1x8x16xf32> to vector<8x16xf32>
    %c3_154 = arith.constant 3 : index
    %c4_155 = arith.constant 4 : index
    %157 = memref.load %arg3[%c3_154, %c4_155] : memref<4x8xf32, #tpu.memory_space<smem>>
    %158 = vector.broadcast %157 : f32 to vector<8x16xf32>
    %159 = arith.mulf %156, %158 : vector<8x16xf32>
    %160 = arith.addf %154, %159 : vector<8x16xf32>
    %cst_156 = arith.constant dense<0.000000e+00> : vector<8x32xf32>
    %161 = tpu.matmul %160, %0, %cst_156 {dimension_numbers = #tpu.dot_dimension_numbers<[1], [0], [0], [1], [0, 0, 1, 1], [], []>} : vector<8x16xf32>, vector<16x32xf32>, vector<8x32xf32> -> vector<8x32xf32>
    %162 = vector.broadcast %137 : f32 to vector<8x32xf32>
    %163 = arith.addf %161, %162 : vector<8x32xf32>
    %c0_157 = arith.constant 0 : index
    %c4_158 = arith.constant 4 : index
    %c0_159 = arith.constant 0 : index
    %c0_160 = arith.constant 0 : index
    %164 = vector.load %arg6[%c0_157, %c4_158, %c0_159, %c0_160] : memref<1x8x8x64xf32, #tpu.memory_space<vmem>>, vector<1x1x8x32xf32>
    %165 = vector.shape_cast %164 : vector<1x1x8x32xf32> to vector<8x32xf32>
    %166 = vector.shape_cast %163 : vector<8x32xf32> to vector<1x1x8x32xf32>
    tpu.vector_store %arg6[%c0_157, %c4_158, %c0_159, %c0_160], %166 {strides = array<i32>} : memref<1x8x8x64xf32, #tpu.memory_space<vmem>>, vector<1x1x8x32xf32>,
    %167 = vector.broadcast %137 : f32 to vector<8x32xf32>
    %c0_161 = arith.constant 0 : index
    %c4_162 = arith.constant 4 : index
    %c0_163 = arith.constant 0 : index
    %c32_164 = arith.constant 32 : index
    %168 = vector.load %arg6[%c0_161, %c4_162, %c0_163, %c32_164] : memref<1x8x8x64xf32, #tpu.memory_space<vmem>>, vector<1x1x8x32xf32>
    %169 = vector.shape_cast %168 : vector<1x1x8x32xf32> to vector<8x32xf32>
    %170 = vector.shape_cast %167 : vector<8x32xf32> to vector<1x1x8x32xf32>
    tpu.vector_store %arg6[%c0_161, %c4_162, %c0_163, %c32_164], %170 {strides = array<i32>} : memref<1x8x8x64xf32, #tpu.memory_space<vmem>>, vector<1x1x8x32xf32>,
    %c5 = arith.constant 5 : index
    %171 = memref.load %arg4[%c5] : memref<8xf32, #tpu.memory_space<smem>>
    %c0_165 = arith.constant 0 : index
    %c0_166 = arith.constant 0 : index
    %c0_167 = arith.constant 0 : index
    %c0_168 = arith.constant 0 : index
    %172 = vector.load %arg2[%c0_165, %c0_166, %c0_167, %c0_168] : memref<1x4x8x16xf32, #tpu.memory_space<vmem>>, vector<1x1x8x16xf32>
    %173 = vector.shape_cast %172 : vector<1x1x8x16xf32> to vector<8x16xf32>
    %c0_169 = arith.constant 0 : index
    %c5_170 = arith.constant 5 : index
    %174 = memref.load %arg3[%c0_169, %c5_170] : memref<4x8xf32, #tpu.memory_space<smem>>
    %175 = vector.broadcast %174 : f32 to vector<8x16xf32>
    %176 = arith.mulf %173, %175 : vector<8x16xf32>
    %c0_171 = arith.constant 0 : index
    %c1_172 = arith.constant 1 : index
    %c0_173 = arith.constant 0 : index
    %c0_174 = arith.constant 0 : index
    %177 = vector.load %arg2[%c0_171, %c1_172, %c0_173, %c0_174] : memref<1x4x8x16xf32, #tpu.memory_space<vmem>>, vector<1x1x8x16xf32>
    %178 = vector.shape_cast %177 : vector<1x1x8x16xf32> to vector<8x16xf32>
    %c1_175 = arith.constant 1 : index
    %c5_176 = arith.constant 5 : index
    %179 = memref.load %arg3[%c1_175, %c5_176] : memref<4x8xf32, #tpu.memory_space<smem>>
    %180 = vector.broadcast %179 : f32 to vector<8x16xf32>
    %181 = arith.mulf %178, %180 : vector<8x16xf32>
    %182 = arith.addf %176, %181 : vector<8x16xf32>
    %c0_177 = arith.constant 0 : index
    %c2_178 = arith.constant 2 : index
    %c0_179 = arith.constant 0 : index
    %c0_180 = arith.constant 0 : index
    %183 = vector.load %arg2[%c0_177, %c2_178, %c0_179, %c0_180] : memref<1x4x8x16xf32, #tpu.memory_space<vmem>>, vector<1x1x8x16xf32>
    %184 = vector.shape_cast %183 : vector<1x1x8x16xf32> to vector<8x16xf32>
    %c2_181 = arith.constant 2 : index
    %c5_182 = arith.constant 5 : index
    %185 = memref.load %arg3[%c2_181, %c5_182] : memref<4x8xf32, #tpu.memory_space<smem>>
    %186 = vector.broadcast %185 : f32 to vector<8x16xf32>
    %187 = arith.mulf %184, %186 : vector<8x16xf32>
    %188 = arith.addf %182, %187 : vector<8x16xf32>
    %c0_183 = arith.constant 0 : index
    %c3_184 = arith.constant 3 : index
    %c0_185 = arith.constant 0 : index
    %c0_186 = arith.constant 0 : index
    %189 = vector.load %arg2[%c0_183, %c3_184, %c0_185, %c0_186] : memref<1x4x8x16xf32, #tpu.memory_space<vmem>>, vector<1x1x8x16xf32>
    %190 = vector.shape_cast %189 : vector<1x1x8x16xf32> to vector<8x16xf32>
    %c3_187 = arith.constant 3 : index
    %c5_188 = arith.constant 5 : index
    %191 = memref.load %arg3[%c3_187, %c5_188] : memref<4x8xf32, #tpu.memory_space<smem>>
    %192 = vector.broadcast %191 : f32 to vector<8x16xf32>
    %193 = arith.mulf %190, %192 : vector<8x16xf32>
    %194 = arith.addf %188, %193 : vector<8x16xf32>
    %cst_189 = arith.constant dense<0.000000e+00> : vector<8x32xf32>
    %195 = tpu.matmul %194, %0, %cst_189 {dimension_numbers = #tpu.dot_dimension_numbers<[1], [0], [0], [1], [0, 0, 1, 1], [], []>} : vector<8x16xf32>, vector<16x32xf32>, vector<8x32xf32> -> vector<8x32xf32>
    %196 = vector.broadcast %171 : f32 to vector<8x32xf32>
    %197 = arith.addf %195, %196 : vector<8x32xf32>
    %c0_190 = arith.constant 0 : index
    %c5_191 = arith.constant 5 : index
    %c0_192 = arith.constant 0 : index
    %c0_193 = arith.constant 0 : index
    %198 = vector.load %arg6[%c0_190, %c5_191, %c0_192, %c0_193] : memref<1x8x8x64xf32, #tpu.memory_space<vmem>>, vector<1x1x8x32xf32>
    %199 = vector.shape_cast %198 : vector<1x1x8x32xf32> to vector<8x32xf32>
    %200 = vector.shape_cast %197 : vector<8x32xf32> to vector<1x1x8x32xf32>
    tpu.vector_store %arg6[%c0_190, %c5_191, %c0_192, %c0_193], %200 {strides = array<i32>} : memref<1x8x8x64xf32, #tpu.memory_space<vmem>>, vector<1x1x8x32xf32>,
    %201 = vector.broadcast %171 : f32 to vector<8x32xf32>
    %c0_194 = arith.constant 0 : index
    %c5_195 = arith.constant 5 : index
    %c0_196 = arith.constant 0 : index
    %c32_197 = arith.constant 32 : index
    %202 = vector.load %arg6[%c0_194, %c5_195, %c0_196, %c32_197] : memref<1x8x8x64xf32, #tpu.memory_space<vmem>>, vector<1x1x8x32xf32>
    %203 = vector.shape_cast %202 : vector<1x1x8x32xf32> to vector<8x32xf32>
    %204 = vector.shape_cast %201 : vector<8x32xf32> to vector<1x1x8x32xf32>
    tpu.vector_store %arg6[%c0_194, %c5_195, %c0_196, %c32_197], %204 {strides = array<i32>} : memref<1x8x8x64xf32, #tpu.memory_space<vmem>>, vector<1x1x8x32xf32>,
    %c6 = arith.constant 6 : index
    %205 = memref.load %arg4[%c6] : memref<8xf32, #tpu.memory_space<smem>>
    %c0_198 = arith.constant 0 : index
    %c0_199 = arith.constant 0 : index
    %c0_200 = arith.constant 0 : index
    %c0_201 = arith.constant 0 : index
    %206 = vector.load %arg2[%c0_198, %c0_199, %c0_200, %c0_201] : memref<1x4x8x16xf32, #tpu.memory_space<vmem>>, vector<1x1x8x16xf32>
    %207 = vector.shape_cast %206 : vector<1x1x8x16xf32> to vector<8x16xf32>
    %c0_202 = arith.constant 0 : index
    %c6_203 = arith.constant 6 : index
    %208 = memref.load %arg3[%c0_202, %c6_203] : memref<4x8xf32, #tpu.memory_space<smem>>
    %209 = vector.broadcast %208 : f32 to vector<8x16xf32>
    %210 = arith.mulf %207, %209 : vector<8x16xf32>
    %c0_204 = arith.constant 0 : index
    %c1_205 = arith.constant 1 : index
    %c0_206 = arith.constant 0 : index
    %c0_207 = arith.constant 0 : index
    %211 = vector.load %arg2[%c0_204, %c1_205, %c0_206, %c0_207] : memref<1x4x8x16xf32, #tpu.memory_space<vmem>>, vector<1x1x8x16xf32>
    %212 = vector.shape_cast %211 : vector<1x1x8x16xf32> to vector<8x16xf32>
    %c1_208 = arith.constant 1 : index
    %c6_209 = arith.constant 6 : index
    %213 = memref.load %arg3[%c1_208, %c6_209] : memref<4x8xf32, #tpu.memory_space<smem>>
    %214 = vector.broadcast %213 : f32 to vector<8x16xf32>
    %215 = arith.mulf %212, %214 : vector<8x16xf32>
    %216 = arith.addf %210, %215 : vector<8x16xf32>
    %c0_210 = arith.constant 0 : index
    %c2_211 = arith.constant 2 : index
    %c0_212 = arith.constant 0 : index
    %c0_213 = arith.constant 0 : index
    %217 = vector.load %arg2[%c0_210, %c2_211, %c0_212, %c0_213] : memref<1x4x8x16xf32, #tpu.memory_space<vmem>>, vector<1x1x8x16xf32>
    %218 = vector.shape_cast %217 : vector<1x1x8x16xf32> to vector<8x16xf32>
    %c2_214 = arith.constant 2 : index
    %c6_215 = arith.constant 6 : index
    %219 = memref.load %arg3[%c2_214, %c6_215] : memref<4x8xf32, #tpu.memory_space<smem>>
    %220 = vector.broadcast %219 : f32 to vector<8x16xf32>
    %221 = arith.mulf %218, %220 : vector<8x16xf32>
    %222 = arith.addf %216, %221 : vector<8x16xf32>
    %c0_216 = arith.constant 0 : index
    %c3_217 = arith.constant 3 : index
    %c0_218 = arith.constant 0 : index
    %c0_219 = arith.constant 0 : index
    %223 = vector.load %arg2[%c0_216, %c3_217, %c0_218, %c0_219] : memref<1x4x8x16xf32, #tpu.memory_space<vmem>>, vector<1x1x8x16xf32>
    %224 = vector.shape_cast %223 : vector<1x1x8x16xf32> to vector<8x16xf32>
    %c3_220 = arith.constant 3 : index
    %c6_221 = arith.constant 6 : index
    %225 = memref.load %arg3[%c3_220, %c6_221] : memref<4x8xf32, #tpu.memory_space<smem>>
    %226 = vector.broadcast %225 : f32 to vector<8x16xf32>
    %227 = arith.mulf %224, %226 : vector<8x16xf32>
    %228 = arith.addf %222, %227 : vector<8x16xf32>
    %cst_222 = arith.constant dense<0.000000e+00> : vector<8x32xf32>
    %229 = tpu.matmul %228, %0, %cst_222 {dimension_numbers = #tpu.dot_dimension_numbers<[1], [0], [0], [1], [0, 0, 1, 1], [], []>} : vector<8x16xf32>, vector<16x32xf32>, vector<8x32xf32> -> vector<8x32xf32>
    %230 = vector.broadcast %205 : f32 to vector<8x32xf32>
    %231 = arith.addf %229, %230 : vector<8x32xf32>
    %c0_223 = arith.constant 0 : index
    %c6_224 = arith.constant 6 : index
    %c0_225 = arith.constant 0 : index
    %c0_226 = arith.constant 0 : index
    %232 = vector.load %arg6[%c0_223, %c6_224, %c0_225, %c0_226] : memref<1x8x8x64xf32, #tpu.memory_space<vmem>>, vector<1x1x8x32xf32>
    %233 = vector.shape_cast %232 : vector<1x1x8x32xf32> to vector<8x32xf32>
    %234 = vector.shape_cast %231 : vector<8x32xf32> to vector<1x1x8x32xf32>
    tpu.vector_store %arg6[%c0_223, %c6_224, %c0_225, %c0_226], %234 {strides = array<i32>} : memref<1x8x8x64xf32, #tpu.memory_space<vmem>>, vector<1x1x8x32xf32>,
    %235 = vector.broadcast %205 : f32 to vector<8x32xf32>
    %c0_227 = arith.constant 0 : index
    %c6_228 = arith.constant 6 : index
    %c0_229 = arith.constant 0 : index
    %c32_230 = arith.constant 32 : index
    %236 = vector.load %arg6[%c0_227, %c6_228, %c0_229, %c32_230] : memref<1x8x8x64xf32, #tpu.memory_space<vmem>>, vector<1x1x8x32xf32>
    %237 = vector.shape_cast %236 : vector<1x1x8x32xf32> to vector<8x32xf32>
    %238 = vector.shape_cast %235 : vector<8x32xf32> to vector<1x1x8x32xf32>
    tpu.vector_store %arg6[%c0_227, %c6_228, %c0_229, %c32_230], %238 {strides = array<i32>} : memref<1x8x8x64xf32, #tpu.memory_space<vmem>>, vector<1x1x8x32xf32>,
    %c7 = arith.constant 7 : index
    %239 = memref.load %arg4[%c7] : memref<8xf32, #tpu.memory_space<smem>>
    %c0_231 = arith.constant 0 : index
    %c0_232 = arith.constant 0 : index
    %c0_233 = arith.constant 0 : index
    %c0_234 = arith.constant 0 : index
    %240 = vector.load %arg2[%c0_231, %c0_232, %c0_233, %c0_234] : memref<1x4x8x16xf32, #tpu.memory_space<vmem>>, vector<1x1x8x16xf32>
    %241 = vector.shape_cast %240 : vector<1x1x8x16xf32> to vector<8x16xf32>
    %c0_235 = arith.constant 0 : index
    %c7_236 = arith.constant 7 : index
    %242 = memref.load %arg3[%c0_235, %c7_236] : memref<4x8xf32, #tpu.memory_space<smem>>
    %243 = vector.broadcast %242 : f32 to vector<8x16xf32>
    %244 = arith.mulf %241, %243 : vector<8x16xf32>
    %c0_237 = arith.constant 0 : index
    %c1_238 = arith.constant 1 : index
    %c0_239 = arith.constant 0 : index
    %c0_240 = arith.constant 0 : index
    %245 = vector.load %arg2[%c0_237, %c1_238, %c0_239, %c0_240] : memref<1x4x8x16xf32, #tpu.memory_space<vmem>>, vector<1x1x8x16xf32>
    %246 = vector.shape_cast %245 : vector<1x1x8x16xf32> to vector<8x16xf32>
    %c1_241 = arith.constant 1 : index
    %c7_242 = arith.constant 7 : index
    %247 = memref.load %arg3[%c1_241, %c7_242] : memref<4x8xf32, #tpu.memory_space<smem>>
    %248 = vector.broadcast %247 : f32 to vector<8x16xf32>
    %249 = arith.mulf %246, %248 : vector<8x16xf32>
    %250 = arith.addf %244, %249 : vector<8x16xf32>
    %c0_243 = arith.constant 0 : index
    %c2_244 = arith.constant 2 : index
    %c0_245 = arith.constant 0 : index
    %c0_246 = arith.constant 0 : index
    %251 = vector.load %arg2[%c0_243, %c2_244, %c0_245, %c0_246] : memref<1x4x8x16xf32, #tpu.memory_space<vmem>>, vector<1x1x8x16xf32>
    %252 = vector.shape_cast %251 : vector<1x1x8x16xf32> to vector<8x16xf32>
    %c2_247 = arith.constant 2 : index
    %c7_248 = arith.constant 7 : index
    %253 = memref.load %arg3[%c2_247, %c7_248] : memref<4x8xf32, #tpu.memory_space<smem>>
    %254 = vector.broadcast %253 : f32 to vector<8x16xf32>
    %255 = arith.mulf %252, %254 : vector<8x16xf32>
    %256 = arith.addf %250, %255 : vector<8x16xf32>
    %c0_249 = arith.constant 0 : index
    %c3_250 = arith.constant 3 : index
    %c0_251 = arith.constant 0 : index
    %c0_252 = arith.constant 0 : index
    %257 = vector.load %arg2[%c0_249, %c3_250, %c0_251, %c0_252] : memref<1x4x8x16xf32, #tpu.memory_space<vmem>>, vector<1x1x8x16xf32>
    %258 = vector.shape_cast %257 : vector<1x1x8x16xf32> to vector<8x16xf32>
    %c3_253 = arith.constant 3 : index
    %c7_254 = arith.constant 7 : index
    %259 = memref.load %arg3[%c3_253, %c7_254] : memref<4x8xf32, #tpu.memory_space<smem>>
    %260 = vector.broadcast %259 : f32 to vector<8x16xf32>
    %261 = arith.mulf %258, %260 : vector<8x16xf32>
    %262 = arith.addf %256, %261 : vector<8x16xf32>
    %cst_255 = arith.constant dense<0.000000e+00> : vector<8x32xf32>
    %263 = tpu.matmul %262, %0, %cst_255 {dimension_numbers = #tpu.dot_dimension_numbers<[1], [0], [0], [1], [0, 0, 1, 1], [], []>} : vector<8x16xf32>, vector<16x32xf32>, vector<8x32xf32> -> vector<8x32xf32>
    %264 = vector.broadcast %239 : f32 to vector<8x32xf32>
    %265 = arith.addf %263, %264 : vector<8x32xf32>
    %c0_256 = arith.constant 0 : index
    %c7_257 = arith.constant 7 : index
    %c0_258 = arith.constant 0 : index
    %c0_259 = arith.constant 0 : index
    %266 = vector.load %arg6[%c0_256, %c7_257, %c0_258, %c0_259] : memref<1x8x8x64xf32, #tpu.memory_space<vmem>>, vector<1x1x8x32xf32>
    %267 = vector.shape_cast %266 : vector<1x1x8x32xf32> to vector<8x32xf32>
    %268 = vector.shape_cast %265 : vector<8x32xf32> to vector<1x1x8x32xf32>
    tpu.vector_store %arg6[%c0_256, %c7_257, %c0_258, %c0_259], %268 {strides = array<i32>} : memref<1x8x8x64xf32, #tpu.memory_space<vmem>>, vector<1x1x8x32xf32>,
    %269 = vector.broadcast %239 : f32 to vector<8x32xf32>
    %c0_260 = arith.constant 0 : index
    %c7_261 = arith.constant 7 : index
    %c0_262 = arith.constant 0 : index
    %c32_263 = arith.constant 32 : index
    %270 = vector.load %arg6[%c0_260, %c7_261, %c0_262, %c32_263] : memref<1x8x8x64xf32, #tpu.memory_space<vmem>>, vector<1x1x8x32xf32>
    %271 = vector.shape_cast %270 : vector<1x1x8x32xf32> to vector<8x32xf32>
    %272 = vector.shape_cast %269 : vector<8x32xf32> to vector<1x1x8x32xf32>
    tpu.vector_store %arg6[%c0_260, %c7_261, %c0_262, %c32_263], %272 {strides = array<i32>} : memref<1x8x8x64xf32, #tpu.memory_space<vmem>>, vector<1x1x8x32xf32>,
    return
  }
  func.func @transform_0(%arg0: i32, %arg1: i32) -> (i32, i32, i32, i32) {
    %c0_i32 = arith.constant 0 : i32
    %c0_i32_0 = arith.constant 0 : i32
    %c0_i32_1 = arith.constant 0 : i32
    return %arg0, %c0_i32, %arg1, %c0_i32_0 : i32, i32, i32, i32
  }
  func.func @transform_1(%arg0: i32, %arg1: i32) -> (i32, i32) {
    %c0_i32 = arith.constant 0 : i32
    %c0_i32_0 = arith.constant 0 : i32
    %c0_i32_1 = arith.constant 0 : i32
    return %c0_i32, %c0_i32_0 : i32, i32
  }
  func.func @transform_2(%arg0: i32, %arg1: i32) -> i32 {
    %c0_i32 = arith.constant 0 : i32
    %c0_i32_0 = arith.constant 0 : i32
    return %c0_i32 : i32
  }
  func.func @transform_3(%arg0: i32, %arg1: i32) -> (i32, i32) {
    %c0_i32 = arith.constant 0 : i32
    %c0_i32_0 = arith.constant 0 : i32
    %c0_i32_1 = arith.constant 0 : i32
    return %c0_i32, %c0_i32_0 : i32, i32
  }
  func.func @transform_4(%arg0: i32, %arg1: i32) -> (i32, i32, i32, i32) {
    %c0_i32 = arith.constant 0 : i32
    %c0_i32_0 = arith.constant 0 : i32
    %c0_i32_1 = arith.constant 0 : i32
    return %arg0, %c0_i32, %arg1, %c0_i32_0 : i32, i32, i32, i32
  }
}

</mosaic_0001>

<bundles_post_ra>
// kernel: tpu_custom_call.1
= control target key start
LH: loop header
LB: loop body
LE: loop exit
PB: predicated region body
PF: predicated region fallthrough
CT: control target
= control target key end

     0   :  { %s2270_s0 = inlined_call_operand.hbm [shape: f32[2,4,16,16], index: 0, kind: input, shape index: {}]   ;;  %s2271_s1 = inlined_call_operand.hbm [shape: f32[4,8], index: 1, kind: input, shape index: {}]   ;;  %s2272_s2 = inlined_call_operand.vmem [shape: f32[8], index: 2, kind: input, shape index: {}]   ;;  %s2273_s3 = inlined_call_operand.hbm [shape: f32[16,32], index: 3, kind: input, shape index: {}]   ;;  %s2274_s4 = inlined_call_operand.hbm [shape: f32[2,8,16,64], index: 4, kind: output, shape index: {}]  }
   0x1   :  { %2281 = sst [smem:[#allocation17_spill]] %s2270_s0 }
   0x2   :  { %2282 = sst [smem:[#allocation18_spill]] %s2271_s1 }
   0x3   :  { %2283 = sst [smem:[#allocation19_spill]] %s2272_s2 }
   0x4   :  { %2284 = sst [smem:[#allocation20_spill]] %s2273_s3 }
   0x5   :  { %9 = vsyncpa [#allocation3], 0 }
   0x6   :  { %11 = vsyncpa [#allocation3 + $0x1], 0 }
   0x7   :  { %12 = vsyncpa [#allocation5], 0 }
   0x8   :  { %13 = vsyncpa [#allocation6], 0 }
   0x9   :  { %14 = vsyncpa [#allocation10], 0 }
   0xa   :  { %15 = vsyncpa [#allocation4], 0 }
   0xb   :  { %17 = vsyncpa [#allocation4 + $0x1], 0  ;;  %s1757_s15 = smov 0   ;;  %s1759_s16 = smov 0  }
   0xc   :  { %s1761_s17 = smov 0   ;;  %s1763_s18 = smov 0  }
   0xd   :  { %s1765_s19 = smov 0   ;;  %s1767_s20 = smov 0  }
   0xe   :  { %s1769_s21 = smov 0   ;;  %s1771_s22 = smov 0  }
   0xf LB: > { %s1193_s23 = sadd.s32 4294967295, %s1716_s22   ;;  %s1194_s24 = sadd.s32 4294967294, %s1716_s22   ;;  %s1716_s22 = sphi %s1771_s22, %s23_s22   ;;  %s1712_s21 = sphi %s1769_s21, %s2310_s21   ;;  %s1708_s20 = sphi %s1767_s20, %s2309_s20   ;;  %s1704_s19 = sphi %s1765_s19, %s2308_s19   ;;  %s1700_s18 = sphi %s1763_s18, %s2307_s18   ;;  %s1696_s17 = sphi %s1761_s17, %s2306_s17   ;;  %s1692_s16 = sphi %s1759_s16, %s2305_s16   ;;  %s1688_s15 = sphi %s1757_s15, %s2304_s15  }
  0x10   : > { %p51_p0 = scmp.ne.s32.totalorder %s1696_s17, %s1692_s16  ;;  %p52_p1 = scmp.eq.s32.totalorder %s1716_s22, 0 }
  0x11   : > { %p57_p2 = scmp.ne.s32.totalorder %s1692_s16, %s1688_s15  ;;  %p1805_p3 = scmp.eq.s32.totalorder %s1193_s23, 0 }
  0x12   : > { %p146_p4 = scmp.eq.s32.totalorder %s1193_s23, 3  ;;  %p53_p5 = por %p52_p1, %p51_p0 }
  0x13   : > { %s2285_s26 = scalar_select %p1805_p3, 1, 0 }
  0x14   : > { %p152_p6 = scmp.eq.s32.totalorder %s1194_s24, 3  ;;  %p1811_p7 = por %p1805_p3, %p57_p2 }
  0x15   : > { %p1815_p8 = por %p146_p4, %p51_p0  ;;  %p1195_p10 = scmp.ge.s32.totalorder %s1716_s22, 1 }
  0x16   : > { %s2286_s27 = scalar_select %p1811_p7, 1, 0 }
  0x17   : > { %s2287_s28 = scalar_select %p1815_p8, 1, 0 }
  0x18   : > { %p1819_p9 = por %p152_p6, %p57_p2  ;;  %p159_p11 = scmp.lt.s32.totalorder %s1716_s22, 5 }
  0x19   : > { %p1439_p13 = scmp.lt.s32.totalorder %s1716_s22, 4  ;;  %s2290_s2 = sld [smem:[#allocation19_spill]] }
  0x1a   : > { %s2288_s29 = scalar_select %p1819_p9, 1, 0 }
  0x1b   : > { %p1825_p12 = pnand %p1195_p10, %p159_p11  ;;  %p1835_p1 = pnand %p1439_p13, %p53_p5 }
  0x1c   : > { %s1718_s10 = smov [#allocation9]   ;;  %s2293_s1 = sld [smem:[#allocation18_spill]] }
  0x1d   : > { %p1418_p0 = pneg %p1825_p12  ;;  %s191_s11 = sshll.u32 %s1718_s10, 4  ;;  %s1845_s11 = int_to_ptr.vmem [resolvable:$true] %s191_s11 }
  0x1f   : > { %s181_s7 = sshll.u32 %s2290_s2, 4  ;;  %p1841_p2 = pnand %p1418_p0, %p1805_p3  ;;  %s182_s7 = int_to_ptr.vmem [resolvable:$true] %s181_s7 }
  0x21   : > { %p1522_p5 = pneg %p1841_p2 }
  0x22   : > { %s1520_s14 = scalar_lea.hbm %s2293_s1, 64 }
  0x23   : > { %p1521_p4 = scmp.ne.s32.totalorder %s2293_s1, %s1520_s14  ;;  %p1527_p11 = scmp.lt.u32.totalorder %s1520_s14, %s2293_s1 }
  0x25   : > { %p1523_p6 = pnand %p1522_p5, %p1521_p4 }
  0x27   : > { %p1524_p10 = pneg %p1523_p6 }
  0x29   : > { %p1529_p13 = pnand %p1527_p11, %p1524_p10 }
  0x2b   : > { %1532 = shalt.err (!%p1529_p13)
}
  0x2c   : > { %s1719_s10 = smov [#allocation7]   ;;  %s1533_s23 = scalar_lea.vmem %s182_s7, 16 }
  0x2d   : > { %1421 = dma.hbm_to_smem (!%p1841_p2), %s2293_s1, 64, %s1719_s10, [#allocation5]  }
  0x2e   : > { %p1534_p0 = scmp.ne.s32.totalorder %s182_s7, %s1533_s23  ;;  %p1541_p9 = scmp.lt.s32.totalorder %s182_s7, %s182_s7 }
  0x2f   : > { %p1542_p8 = scmp.lt.s32.totalorder %s1533_s23, %s1533_s23 }
  0x30   : > { %p1536_p4 = pnand %p1534_p0, %p1522_p5 }
  0x31   : > { %p1543_p3 = por %p1542_p8, %p1541_p9 }
  0x32   : > { %p1537_p6 = pneg %p1536_p4 }
  0x34   : > { %p1544_p7 = pnand %p1543_p3, %p1537_p6 }
  0x36   : > { %1547 = shalt.err (!%p1544_p7)
}
  0x37   : > { %s1720_s14 = smov [#allocation8]   ;;  %s2294_s3 = sld [smem:[#allocation20_spill]] }
  0x38   : > { %1424 = dma.vmem_to_smem (!%p1841_p2), %s182_s7, 16, %s1720_s14, [#allocation6]  }
  0x3d   : > { %s1548_s6 = scalar_lea.hbm %s2294_s3, 256 }
  0x3e   : > { %p1549_p10 = scmp.ne.s32.totalorder %s2294_s3, %s1548_s6  ;;  %p1555_p3 = scmp.lt.u32.totalorder %s1548_s6, %s2294_s3 }
  0x40   : > { %p1551_p11 = pnand %p1549_p10, %p1522_p5 }
  0x42   : > { %p1552_p13 = pneg %p1551_p11 }
  0x44   : > { %p1557_p7 = pnand %p1555_p3, %p1552_p13 }
  0x46   : > { %1560 = shalt.err (!%p1557_p7)
}
  0x47   : > { %s1561_s7 = scalar_lea.vmem %s1845_s11, 256  ;;  %p1569_p4 = scmp.lt.s32.totalorder %s1845_s11, %s1845_s11 }
  0x48   : > { %p1562_p8 = scmp.ne.s32.totalorder %s1845_s11, %s1561_s7  ;;  %p1570_p6 = scmp.lt.s32.totalorder %s1561_s7, %s1561_s7 }
  0x4a   : > { %p1564_p9 = pnand %p1562_p8, %p1522_p5  ;;  %p1571_p10 = por %p1570_p6, %p1569_p4 }
  0x4c   : > { %p1565_p0 = pneg %p1564_p9 }
  0x4e   : > { %p1572_p11 = pnand %p1571_p10, %p1565_p0 }
  0x50   : > { %1575 = shalt.err (!%p1572_p11)
}
  0x51   : > { %s2279_s14 = smov 128   ;;  %s2280_s24 = smov 8  }
  0x52   : > { %1427 = dma.hbm_to_vmem [thread:$0]  (!%p1841_p2), %s2294_s3, 256, %s1845_s11, [#allocation10], %s2279_s14, %s2279_s14, %s2280_s24  }
  0x53   : > { %s32_s10 = sadd.s32 1, %s1708_s20  ;;  %s35_s12 = sadd.s32 1, %s1712_s21 }
  0x54   : > { %p33_p5 = scmp.ge.s32.totalorder %s32_s10, 2  ;;  %s205_s13 = sand.u32 1, %s1696_s17  }
  0x55   : > { %s1201_s23 = sshll.u32 %s1712_s21, 3  ;;  %s1200_s9 = sshll.u32 %s205_s13, 5 }
  0x56   : > { %s2312_s10 = smov (%p33_p5, %s32_s10), 0  ;;  %s2314_s12 = smov (!%p33_p5, %s35_s12), %s1712_s21 }
  0x57   : > { %s40_s7 = ssub.s32 %s1708_s20, %s2312_s10  ;;  %p37_p13 = scmp.ge.s32.totalorder %s2314_s12, 2 }
  0x58   : > { %s214_s25 = sadd.s32 %s1708_s20, %s1201_s23  ;;  %s209_s5 = scalar_lea.vmem [#allocation2], %s1200_s9 }
  0x59   : > { %s2316_s12 = smov (%p37_p13, %s2314_s12), 0  ;;  %s1202_s11 = sshll.u32 %s214_s25, 7 }
  0x5a   : > { %s217_s6 = sshll.u32 %s209_s5, 4  ;;  %s39_s14 = ssub.s32 %s1712_s21, %s2316_s12  ;;  %s1920_s6 = int_to_ptr.vmem [resolvable:$true] %s217_s6 }
  0x5b   : > { %s2295_s0 = sld [smem:[#allocation17_spill]]  ;;  %s1918_s3 = sor.u32 %s40_s7, %s39_s14 }
  0x5c   : > { %s1923_s23 = scalar_lea.sflag [#allocation3], %s205_s13  ;;  %p1578_p7 = pneg %p1835_p1 }
  0x61   : > { %s1916_s2 = scalar_lea.hbm %s2295_s0, %s1202_s11  ;;  %s1581_s9 = scalar_lea.hbm %s2295_s0, 2048 }
  0x62   : > { %s1576_s25 = scalar_lea.hbm %s1916_s2, 512  ;;  %p1582_p0 = scmp.lt.u32.totalorder %s1916_s2, %s2295_s0 }
  0x63   : > { %p1577_p3 = scmp.ne.s32.totalorder %s1916_s2, %s1576_s25  ;;  %p1583_p4 = scmp.lt.u32.totalorder %s1581_s9, %s1576_s25 }
  0x64   : > { %p1585_p10 = scmp.lt.u32.totalorder %s1576_s25, %s1916_s2 }
  0x65   : > { %p1579_p8 = pnand %p1578_p7, %p1577_p3  ;;  %p1584_p6 = por %p1583_p4, %p1582_p0 }
  0x67   : > { %p1580_p9 = pneg %p1579_p8  ;;  %p1586_p11 = por %p1585_p10, %p1584_p6 }
  0x69   : > { %p1587_p5 = pnand %p1586_p11, %p1580_p9 }
  0x6b   : > { %1590 = shalt.err (!%p1587_p5)
}
  0x6c   : > { %s1591_s13 = scalar_lea.vmem %s1920_s6, 512  ;;  %s1723_s11 = smov [#allocation2]  }
  0x6d   : > { %p1592_p13 = scmp.ne.s32.totalorder %s1920_s6, %s1591_s13  ;;  %s1596_s5 = sshll.u32 %s1723_s11, 4  ;;  %s1597_s5 = int_to_ptr.vmem [resolvable:$false] %s1596_s5 }
  0x6e   : > { %s1598_s1 = scalar_lea.vmem %s1597_s5, 1024  ;;  %p1599_p2 = scmp.lt.s32.totalorder %s1920_s6, %s1597_s5 }
  0x6f   : > { %p1594_p3 = pnand %p1592_p13, %p1578_p7  ;;  %p1600_p0 = scmp.lt.s32.totalorder %s1598_s1, %s1591_s13 }
  0x71   : > { %p1595_p8 = pneg %p1594_p3  ;;  %p1601_p4 = por %p1600_p0, %p1599_p2 }
  0x73   : > { %p1602_p6 = pnand %p1601_p4, %p1595_p8 }
  0x75   : > { %1605 = shalt.err (!%p1602_p6)
}
  0x76   : > { %s1724_s25 = smov 256   ;;  %s2296_s24 = smov 8  }
  0x77   : > { %s2297_s9 = smov 128   ;;  %s2298_s14 = sadd.s32 1, %s1696_s17 }
  0x78   : > { %1431 = dma.hbm_to_vmem [thread:$0]  (!%p1835_p1), %s1916_s2, 512, %s1920_s6, %s1923_s23, %s1724_s25, %s2297_s9, %s2296_s24  }
  0x79   : > { %p2299_p7 = scmp.eq.s32.totalorder %s1918_s3, 0  ;;  %229 = sbr.rel (%p1825_p12) target bundleno = 403 (0x193), region = 36 }
  0x7a   : > { %s1963_s13 = sand.u32 (!%p1825_p12), 1, %s1692_s16   ;;  %p2300_p2 = scmp.ne.s32.totalorder (!%p1825_p12), %s2286_s27, 0 }
  0x7b   : > { %s1958_s7 = scalar_select %p2299_p7, %s1696_s17, %s2298_s14  }
  0x7c   : > { %s1204_s8 = sshll.u32 (!%p1825_p12), %s1963_s13, 5  ;;  %s232_s11 = scalar_lea.sflag (!%p1825_p12), [#allocation3], %s1963_s13 }
  0x7d   : > { %s1967_s5 = scalar_lea.vmem (!%p1825_p12), [#allocation2], %s1204_s8 }
  0x80   : > { %1667 = dma.done.wait (%p2300_p2), %s232_s11, 512  }
  0x81   : > { %1669 = vsyncadd (%p2300_p2), %s232_s11, 4294966784  ;;  %p2301_p1 = scmp.ne.s32.totalorder %s2285_s26, 0 }
  0x83   : > { %1671 = dma.done.wait (%p2301_p1), [#allocation5], 64  }
  0x84   : > { %1673 = vsyncadd (%p2301_p1), [#allocation5], 4294967232 }
  0x85   : > { %1675 = dma.done.wait (%p2301_p1), [#allocation6], 16  }
  0x86   : > { %1677 = vsyncadd (%p2301_p1), [#allocation6], 4294967280 }
  0x87   : > { %1679 = dma.done.wait (%p2301_p1), [#allocation10], 256  }
  0x88   : > { %1681 = vsyncadd (%p2301_p1), [#allocation10], 4294967040 }
  0x89   : > { %252 = sfence }
  0x8a   : > { %v273_v0 = vld [vmem:[#allocation9] sm:$0xff]  ;;  %v274_v1 = vld [vmem:[#allocation9 + $0x8] sm:$0xff]  ;;  %v1725_v2 = vmov 0.0|0.0   ;;  %s277_s2 = sld [smem:[#allocation7]]  ;;  %vm1726_vm0 = vmmov 0   ;;  %v1727_v4 = vmov 0.0  }
  0x8b   : > { %1378 = vmatprep.subr.bf16.mxu0 %v1725_v2  ;;  %1381 = vmatprep.subr.bf16.mxu1 %v1725_v2  ;;  %v1987_v3 = vpack.c.bf16 %v274_v1, %v273_v0  ;;  %s1210_s3 = sld [smem:[#allocation7 + $0x80]]  ;;  %s1995_s30 = sld [smem:[#allocation7 + $0x1]]  ;;  %v2006_v5 = vld [vmem:[%s1967_s5] sm:$0xff]  ;;  %v2009_v6 = vld [vmem:[%s1967_s5 + $0x8] sm:$0xff]  ;;  %v2016_v7 = vld [vmem:[%s1967_s5 + $0x10] sm:$0xff]  ;;  %vm299_vm1 = vcmask 130048  }
  0x8c   : > { %1326 = vmatprep.mubr.msk.f32.mxu0 %vm1726_vm0, %v1727_v4  ;;  %1333 = vmatprep.mubr.msk.f32.mxu1 %vm1726_vm0, %v1727_v4  ;;  %s1212_s26 = sld [smem:[#allocation7 + $0x100]]  ;;  %s1997_s6 = sld [smem:[#allocation7 + $0x81]]  ;;  %v2019_v8 = vld [vmem:[%s1967_s5 + $0x18] sm:$0xff]  ;;  %vm373_vm2 = vcmask 261120   ;;  %vm375_vm3 = vcmask 523520  }
  0x8d   : > { %s1214_s27 = sld [smem:[#allocation7 + $0x180]]  ;;  %1380 = vmatpush3.bf16.msra.mxu0 %v1987_v3  ;;  %1383 = vmatpush3.bf16.msra.mxu1 %v1987_v3  ;;  %s2001_s23 = sld [smem:[#allocation7 + $0x101]] }
  0x8e   : > { %1384 = vmatprep.subr.bf16.mxu0 %v1725_v2  ;;  %1387 = vmatprep.subr.bf16.mxu1 %v1725_v2  ;;  %s2003_s1 = sld [smem:[#allocation7 + $0x181]]  ;;  %s2011_s25 = sld [smem:[#allocation7 + $0x2]] }
  0x8f   : > { %s2013_s24 = sld [smem:[#allocation7 + $0x82]]  ;;  %s2025_s8 = sld [smem:[#allocation7 + $0x3]] }
  0x90   : > { %s2021_s9 = sld [smem:[#allocation7 + $0x102]]  ;;  %v278_v9 = vstv %s277_s2  ;;  %s2027_s11 = sld [smem:[#allocation7 + $0x83]] }
  0x91   : > { %s2023_s14 = sld [smem:[#allocation7 + $0x182]]  ;;  %v283_v10 = vstv %s1210_s3  ;;  %v279_v11 = vmul.f32 %v278_v9, %v2006_v5  ;;  %s2031_s5 = sld [smem:[#allocation7 + $0x103]]  ;;  %v380_v17 = vstv %s1995_s30 }
  0x92   : > { %v284_v12 = vmul.f32 %v2009_v6, %v283_v10  ;;  %v289_v13 = vstv %s1212_s26  ;;  %s2033_s0 = sld [smem:[#allocation7 + $0x183]]  ;;  %v384_v18 = vstv %s1997_s6  ;;  %s2039_s2 = sld [smem:[#allocation7 + $0x4]]  ;;  %v381_v20 = vmul.f32 %v380_v17, %v2006_v5 }
  0x93   : > { %v295_v14 = vstv %s1214_s27  ;;  %v290_v15 = vmul.f32 %v2016_v7, %v289_v13  ;;  %s2041_s3 = sld [smem:[#allocation7 + $0x84]]  ;;  %v385_v21 = vmul.f32 %v2009_v6, %v384_v18  ;;  %v389_v22 = vstv %s2001_s23  ;;  %s2054_s30 = sld [smem:[#allocation7 + $0x5]] }
  0x94   : > { %v296_v16 = vmul.f32 %v2019_v8, %v295_v14  ;;  %v285_v19 = vadd.f32 %v284_v12, %v279_v11  ;;  %s2046_s26 = sld [smem:[#allocation7 + $0x104]]  ;;  %v390_v23 = vmul.f32 %v2016_v7, %v389_v22  ;;  %v394_v24 = vstv %s2003_s1  ;;  %s2058_s6 = sld [smem:[#allocation7 + $0x85]] }
  0x95   : > { %v477_v25 = vstv %s2011_s25  ;;  %v481_v26 = vstv %s2013_s24  ;;  %s2052_s27 = sld [smem:[#allocation7 + $0x184]]  ;;  %v386_v28 = vadd.f32 %v385_v21, %v381_v20  ;;  %v395_v29 = vmul.f32 %v2019_v8, %v394_v24  ;;  %s2060_s23 = sld [smem:[#allocation7 + $0x105]] }
  0x96   : > { %v291_v27 = vadd.f32 %v290_v15, %v285_v19  ;;  %v478_v30 = vmul.f32 %v477_v25, %v2006_v5  ;;  %v482_v31 = vmul.f32 %v2009_v6, %v481_v26  ;;  %v486_v32 = vstv %s2021_s9  ;;  %s2066_s1 = sld [smem:[#allocation7 + $0x185]]  ;;  %s2068_s25 = sld [smem:[#allocation7 + $0x6]] }
  0x97   : > { %v491_v33 = vstv %s2023_s14  ;;  %v574_v34 = vstv %s2025_s8  ;;  %v391_v36 = vadd.f32 %v390_v23, %v386_v28  ;;  %v487_v37 = vmul.f32 %v2016_v7, %v486_v32  ;;  %s2072_s24 = sld [smem:[#allocation7 + $0x86]]  ;;  %s2091_s8 = sld [smem:[#allocation7 + $0x7]] }
  0x98   : > { %v297_v35 = vadd.f32 %v296_v16, %v291_v27  ;;  %v492_v38 = vmul.f32 %v2019_v8, %v491_v33  ;;  %v483_v39 = vadd.f32 %v482_v31, %v478_v30  ;;  %v575_v40 = vmul.f32 %v574_v34, %v2006_v5  ;;  %s2081_s9 = sld [smem:[#allocation7 + $0x106]]  ;;  %p2302_p9 = scmp.ne.s32.totalorder %s2287_s28, 0 }
  0x99   : > { %v578_v41 = vstv %s2027_s11  ;;  %v583_v42 = vstv %s2031_s5  ;;  %v396_v43 = vadd.f32 %v395_v29, %v391_v36  ;;  %v588_v46 = vstv %s2033_s0  ;;  %s2083_s14 = sld [smem:[#allocation7 + $0x186]]  ;;  %s2098_s0 = sld [smem:[#allocation7 + $0x87]] }
  0x9a   : > { %1327 = vmatmul.mubr.msk.f32.vlgmr.msra.gmra.mrb[0].mxu0 %vm299_vm1, %v297_v35  ;;  %v579_v44 = vmul.f32 %v2009_v6, %v578_v41  ;;  %v584_v45 = vmul.f32 %v2016_v7, %v583_v42  ;;  %v488_v47 = vadd.f32 %v487_v37, %v483_v39  ;;  %v589_v48 = vmul.f32 %v2019_v8, %v588_v46  ;;  %s2100_s11 = sld [smem:[#allocation7 + $0x107]] }
  0x9b   : > { %1386 = vmatpush3.bf16.msra.mxu0 %v1987_v3  ;;  %1340 = vmatprep.mubr.msk.f32.mxu0 %vm1726_vm0, %v1727_v4  ;;  %v671_v49 = vstv %s2039_s2  ;;  %v675_v50 = vstv %s2041_s3  ;;  %v680_v54 = vstv %s2046_s26  ;;  %v685_v57 = vstv %s2052_s27  ;;  %s2108_s5 = sld [smem:[#allocation7 + $0x187]]  ;;  %s275_s2 = sld [smem:[#allocation8]] }
  0x9c   : > { %1334 = vmatmul.mubr.msk.f32.vlgmr.msra.gmra.mrb[0].mxu1 %vm299_vm1, %v396_v43  ;;  %1390 = vmatprep.subr.bf16.mxu0 %v1725_v2  ;;  %v580_v51 = vadd.f32 %v579_v44, %v575_v40  ;;  %v672_v52 = vmul.f32 %v671_v49, %v2006_v5  ;;  %v676_v53 = vmul.f32 %v2009_v6, %v675_v50  ;;  %v768_v58 = vstv %s2054_s30  ;;  %s1216_s3 = sld [smem:[#allocation8 + $0x1]]  ;;  %s2155_s26 = sld [smem:[#allocation8 + $0x2]] }
  0x9d   : > { %1389 = vmatpush3.bf16.msra.mxu1 %v1987_v3  ;;  %1347 = vmatprep.mubr.msk.f32.mxu1 %vm1726_vm0, %v1727_v4  ;;  %v493_v55 = vadd.f32 %v492_v38, %v488_v47  ;;  %v681_v56 = vmul.f32 %v2016_v7, %v680_v54  ;;  %v686_v61 = vmul.f32 %v2019_v8, %v685_v57  ;;  %v772_v63 = vstv %s2058_s6  ;;  %s1208_s27 = sshll.u32 %s1963_s13, 6  ;;  %s2158_s30 = sld [smem:[#allocation8 + $0x3]] }
  0x9e   : > { %1393 = vmatprep.subr.bf16.mxu1 %v1725_v2  ;;  %v585_v59 = vadd.f32 %v584_v45, %v580_v51  ;;  %v677_v60 = vadd.f32 %v676_v53, %v672_v52  ;;  %v769_v62 = vmul.f32 %v768_v58, %v2006_v5  ;;  %v777_v0 = vstv %s2060_s23  ;;  %s2160_s6 = sld [smem:[#allocation8 + $0x4]]  ;;  %s2162_s23 = scalar_lea.vmem [#allocation11], %s1208_s27 }
  0x9f   : > { %1341 = vmatmul.mubr.msk.f32.vlgmr.msra.gmra.mrb[2].mxu0 %vm299_vm1, %v493_v55  ;;  %v782_v1 = vstv %s2066_s1  ;;  %v865_v9 = vstv %s2068_s25  ;;  %v773_v12 = vmul.f32 %v2009_v6, %v772_v63  ;;  %v869_v13 = vstv %s2072_s24  ;;  %s2169_s1 = sld [smem:[#allocation8 + $0x5]]  ;;  %s2176_s25 = sld [smem:[#allocation8 + $0x6]] }
  0xa0   : > { %v590_v10 = vadd.f32 %v589_v48, %v585_v59  ;;  %1392 = vmatpush3.bf16.msra.mxu0 %v1987_v3  ;;  %1354 = vmatprep.mubr.msk.f32.mxu0 %vm1726_vm0, %v1727_v4  ;;  %v682_v11 = vadd.f32 %v681_v56, %v677_v60  ;;  %v778_v14 = vmul.f32 %v2016_v7, %v777_v0  ;;  %v874_v20 = vstv %s2081_s9  ;;  %s2183_s24 = sld [smem:[#allocation8 + $0x7]]  ;;  %s1294_s9 = sshll.u32 %s1704_s19, 4 }
  0xa1   : > { %1396 = vmatprep.subr.bf16.mxu0 %v1725_v2  ;;  %v783_v15 = vmul.f32 %v2019_v8, %v782_v1  ;;  %v866_v16 = vmul.f32 %v865_v9, %v2006_v5  ;;  %v870_v17 = vmul.f32 %v2009_v6, %v869_v13  ;;  %v774_v19 = vadd.f32 %v773_v12, %v769_v62 }
  0xa2   : > { %1348 = vmatmul.mubr.msk.f32.vlgmr.msra.gmra.mrb[2].mxu1 %vm299_vm1, %v590_v10  ;;  %v687_v18 = vadd.f32 %v686_v61, %v682_v11  ;;  %v879_v21 = vstv %s2083_s14  ;;  %v875_v23 = vmul.f32 %v2016_v7, %v874_v20  ;;  %v962_v25 = vstv %s2091_s8  ;;  %s1068_s14 = sadd.s32 %s1700_s18, %s1294_s9  ;;  %s1071_s8 = sshll.u32 %s2162_s23, 4  ;;  %s2212_s8 = int_to_ptr.vmem [resolvable:$true] %s1071_s8 }
  0xa3   : > { %1395 = vmatpush3.bf16.msra.mxu1 %v1987_v3  ;;  %1361 = vmatprep.mubr.msk.f32.mxu1 %vm1726_vm0, %v1727_v4  ;;  %v871_v22 = vadd.f32 %v870_v17, %v866_v16  ;;  %v880_v24 = vmul.f32 %v2019_v8, %v879_v21  ;;  %v779_v26 = vadd.f32 %v778_v14, %v774_v19  ;;  %v966_v28 = vstv %s2098_s0  ;;  %s1295_s19 = sshll.u32 %s1068_s14, 7 }
  0xa4   : > { %1399 = vmatprep.subr.bf16.mxu1 %v1725_v2  ;;  %1355 = vmatmul.mubr.msk.f32.vlgmr.msra.gmra.mrb[4].mxu0 %vm299_vm1, %v687_v18  ;;  %v963_v27 = vmul.f32 %v962_v25, %v2006_v5  ;;  %v971_v29 = vstv %s2100_s11  ;;  %v967_v31 = vmul.f32 %v2009_v6, %v966_v28  ;;  %v976_v33 = vstv %s2108_s5  ;;  %s2208_s11 = scalar_lea.hbm %s2274_s4, %s1295_s19  ;;  %s1057_s5 = scalar_lea.sflag [#allocation4], %s1963_s13 }
  0xa5   : > { %1398 = vmatpush3.bf16.msra.mxu0 %v1987_v3  ;;  %1368 = vmatprep.mubr.msk.f32.mxu0 %vm1726_vm0, %v1727_v4  ;;  %v876_v30 = vadd.f32 %v875_v23, %v871_v22  ;;  %v972_v32 = vmul.f32 %v2016_v7, %v971_v29  ;;  %v784_v2 = vadd.f32 %v783_v15, %v779_v26  ;;  %v298_v7 = vstv %s275_s2  ;;  %s1606_s2 = scalar_lea.vmem %s2212_s8, 1024 }
  0xa6   : > { %v968_v35 = vadd.f32 %v967_v31, %v963_v27  ;;  %v977_v36 = vmul.f32 %v2019_v8, %v976_v33  ;;  %v494_v41 = vstv %s2155_s26  ;;  %v591_v44 = vstv %s2158_s30  ;;  %p1607_p12 = scmp.ne.s32.totalorder %s2212_s8, %s1606_s2 }
  0xa7   : > { %v881_v34 = vadd.f32 %v880_v24, %v876_v30  ;;  %1362 = vmatmul.mubr.msk.f32.vlgmr.msra.gmra.mrb[4].mxu1 %vm299_vm1, %v784_v2  ;;  %v688_v47 = vstv %s2160_s6  ;;  %v785_v53 = vstv %s2169_s1  ;;  %v882_v55 = vstv %s2176_s25 }
  0xa8   : > { %1401 = vmatpush3.bf16.msra.mxu1 %v1987_v3  ;;  %1375 = vmatprep.mubr.msk.f32.mxu1 %vm1726_vm0, %v1727_v4  ;;  %v973_v5 = vadd.f32 %v972_v32, %v968_v35  ;;  %v397_v3 = vstv %s1216_s3  ;;  %v979_v60 = vstv %s2183_s24  ;;  %p1608_p10 = pnand %p1607_p12, %p2302_p9  ;;  %s1728_s3 = smov [#allocation11]  }
  0xa9   : > { %1369 = vmatmul.mubr.msk.f32.vlgmr.msra.gmra.mrb[6].mxu0 %vm299_vm1, %v881_v34  ;;  %s1610_s26 = sshll.u32 %s1728_s3, 4  ;;  %s1611_s26 = int_to_ptr.vmem [resolvable:$false] %s1610_s26 }
  0xaa   : > { %v978_v6 = vadd.f32 %v977_v36, %v973_v5  ;;  %p1609_p11 = pneg %p1608_p10  ;;  %s1612_s27 = scalar_lea.vmem %s1611_s26, 2048 }
  0xab   : > { %p1613_p5 = scmp.lt.s32.totalorder %s2212_s8, %s1611_s26  ;;  %p1614_p13 = scmp.lt.s32.totalorder %s1612_s27, %s1606_s2 }
  0xac   : > { %1376 = vmatmul.mubr.msk.f32.vlgmr.msra.gmra.mrb[6].mxu1 %vm299_vm1, %v978_v6 }
  0xad   : > { %p1615_p3 = por %p1614_p13, %p1613_p5 }
  0xaf   : > { %p1616_p8 = pnand %p1615_p3, %p1609_p11 }
 0x16d   : > { %v369_v8 = vpop.f32.mrb[0].mxu0 }
 0x16e   : > { %v370_v4 = vadd.f32 %v369_v8, %v298_v7  ;;  %v1328_v37 = vpop.f32.mrb[1].mxu0 }
 0x16f   : > { %v467_v38 = vpop.f32.mrb[0].mxu1 }
 0x170   : > { %374 = vst.msk [vmem:[%s2162_s23] sm:$0xff] %vm373_vm2, %v370_v4  ;;  %v468_v39 = vadd.f32 %v467_v38, %v397_v3  ;;  %v1335_v40 = vpop.f32.mrb[1].mxu1 }
 0x171   : > { %376 = vst.msk [vmem:[%s2162_s23] sm:$0xff] %vm375_vm3, %v298_v7 }
 0x172   : > { %1225 = vst.msk [vmem:[%s2162_s23 + $0x8] sm:$0xff] %vm373_vm2, %v468_v39  ;;  %v564_v42 = vpop.f32.mrb[2].mxu0 }
 0x173   : > { %1226 = vst.msk [vmem:[%s2162_s23 + $0x8] sm:$0xff] %vm375_vm3, %v397_v3  ;;  %v565_v43 = vadd.f32 %v564_v42, %v494_v41  ;;  %v1342_v45 = vpop.f32.mrb[3].mxu0 }
 0x175   : > { %1236 = vst.msk [vmem:[%s2162_s23 + $0x10] sm:$0xff] %vm373_vm2, %v565_v43  ;;  %v661_v46 = vpop.f32.mrb[2].mxu1 }
 0x176   : > { %1237 = vst.msk [vmem:[%s2162_s23 + $0x10] sm:$0xff] %vm375_vm3, %v494_v41  ;;  %v662_v48 = vadd.f32 %v661_v46, %v591_v44  ;;  %v1349_v49 = vpop.f32.mrb[3].mxu1 }
 0x177   : > { %v758_v50 = vpop.f32.mrb[4].mxu0 }
 0x178   : > { %1247 = vst.msk [vmem:[%s2162_s23 + $0x18] sm:$0xff] %vm373_vm2, %v662_v48  ;;  %v759_v51 = vadd.f32 %v758_v50, %v688_v47  ;;  %v1356_v52 = vpop.f32.mrb[5].mxu0 }
 0x179   : > { %1248 = vst.msk [vmem:[%s2162_s23 + $0x18] sm:$0xff] %vm375_vm3, %v591_v44 }
 0x17a   : > { %1258 = vst.msk [vmem:[%s2162_s23 + $0x20] sm:$0xff] %vm373_vm2, %v759_v51  ;;  %v855_v54 = vpop.f32.mrb[4].mxu1 }
 0x17b   : > { %1259 = vst.msk [vmem:[%s2162_s23 + $0x20] sm:$0xff] %vm375_vm3, %v688_v47  ;;  %v856_v56 = vadd.f32 %v855_v54, %v785_v53  ;;  %v1363_v57 = vpop.f32.mrb[5].mxu1 }
 0x17c   : > { %v952_v58 = vpop.f32.mrb[6].mxu0 }
 0x17d   : > { %1269 = vst.msk [vmem:[%s2162_s23 + $0x28] sm:$0xff] %vm373_vm2, %v856_v56  ;;  %v953_v59 = vadd.f32 %v952_v58, %v882_v55  ;;  %v1370_v61 = vpop.f32.mrb[7].mxu0 }
 0x17e   : > { %1270 = vst.msk [vmem:[%s2162_s23 + $0x28] sm:$0xff] %vm375_vm3, %v785_v53 }
 0x17f   : > { %1280 = vst.msk [vmem:[%s2162_s23 + $0x30] sm:$0xff] %vm373_vm2, %v953_v59  ;;  %v1049_v62 = vpop.f32.mrb[6].mxu1 }
 0x180   : > { %1281 = vst.msk [vmem:[%s2162_s23 + $0x30] sm:$0xff] %vm375_vm3, %v882_v55  ;;  %v1050_v63 = vadd.f32 %v1049_v62, %v979_v60  ;;  %v1377_v0 = vpop.f32.mrb[7].mxu1 }
 0x182   : > { %1291 = vst.msk [vmem:[%s2162_s23 + $0x38] sm:$0xff] %vm373_vm2, %v1050_v63 }
 0x183   : > { %1292 = vst.msk [vmem:[%s2162_s23 + $0x38] sm:$0xff] %vm375_vm3, %v979_v60 }
 0x184   : > { %1619 = shalt.err (!%p1616_p8)
}
 0x185   : > { %s1620_s30 = scalar_lea.hbm %s2208_s11, 1024  ;;  %s1624_s1 = scalar_lea.hbm %s2274_s4, 4096 }
 0x186   : > { %p1621_p0 = scmp.ne.s32.totalorder %s2208_s11, %s1620_s30  ;;  %p1625_p7 = scmp.lt.u32.totalorder %s2208_s11, %s2274_s4 }
 0x187   : > { %p1626_p2 = scmp.lt.u32.totalorder %s1624_s1, %s1620_s30  ;;  %p1628_p12 = scmp.lt.u32.totalorder %s1620_s30, %s2208_s11 }
 0x188   : > { %p1622_p4 = pnand %p1621_p0, %p2302_p9 }
 0x189   : > { %p1627_p1 = por %p1626_p2, %p1625_p7 }
 0x18a   : > { %p1623_p6 = pneg %p1622_p4 }
 0x18b   : > { %p1629_p10 = por %p1628_p12, %p1627_p1 }
 0x18d   : > { %p1630_p11 = pnand %p1629_p10, %p1623_p6 }
 0x18f   : > { %1633 = shalt.err (!%p1630_p11)
}
 0x190   : > { %s1729_s9 = smov 128   ;;  %s1730_s14 = smov 256  }
 0x191   : > { %s1731_s19 = smov 8  }
 0x192   : > { %1416 = dma.vmem_to_hbm [thread:$0]  (%p2302_p9), %s2212_s8, 1024, %s2208_s11, %s1057_s5, %s1729_s9, %s1730_s14, %s1731_s19  }
 0x193 PF: > { %p1443_p5 = scmp.ge.s32.totalorder %s1716_s22, 2  ;;  %s1086_s18 = sand.u32 1, %s1688_s15  }
 0x194   : > { %p2303_p13 = scmp.ne.s32.totalorder %s2288_s29, 0  ;;  %s1087_s0 = scalar_lea.sflag [#allocation4], %s1086_s18 }
 0x196   : > { %p1433_p3 = pnand %p1443_p5, %p2303_p13 }
 0x198   : > { %1683 = dma.done.wait (!%p1433_p3), %s1087_s0, 1024  }
 0x199   : > { %1685 = vsyncadd (!%p1433_p3), %s1087_s0, 4294966272  ;;  %s23_s22 = sadd.s32 1, %s1716_s22   ;;  %s2304_s15 = smov %s1692_s16 }
 0x19a   : > { %p20_p8 = scmp.ge.s32.totalorder %s23_s22, 6   ;;  %s2305_s16 = smov %s1696_s17 }
 0x19b   : > { %s2306_s17 = smov %s1958_s7  ;;  %s2307_s18 = smov %s1708_s20 }
 0x19c   : > { %s2308_s19 = smov %s1712_s21  ;;  %s2309_s20 = smov %s2312_s10 }
 0x19d   : > { %s2310_s21 = smov %s2316_s12  ;;  %22 = sbr.rel (!%p20_p8) target bundleno = 15 (0xf), region = 105 }
 0x1a4   :  { %1092 = vsyncpa [#allocation3], 1 }
 0x1a5   :  { %1094 = vsyncpa [#allocation3 + $0x1], 1 }
 0x1a6   :  { %1095 = vsyncpa [#allocation10], 1 }
 0x1a7   :  { %1096 = vsyncpa [#allocation4], 1 }
 0x1a8   :  { %1098 = vsyncpa [#allocation4 + $0x1], 1 }
 0x1a9   :  { %1099 = vsyncpa [#allocation5], 1 }
 0x1aa   :  { %1101 = vsyncpa [#allocation5 + $0x1], 1 }
 0x1ab   :  { %1102 = vsyncpa [#allocation6], 1 }
 0x1ac   :  { %1104 = vsyncpa [#allocation6 + $0x1], 1 }

</bundles_post_ra>
